<compile_context>
chip_gen: v7x
topology: tpu7x:2x2x1
jax: 0.10.0
libtpu: 0.0.40
codegen_flags: <defaults>
</compile_context>

<pallas_src>
import jax
import jax.numpy as jnp
from jax.experimental import pallas as pl
from jax.experimental.pallas import tpu as pltpu

LANE = 128   # lane-dense output/feature width (unmasked vst)
K_PAD = 128  # contraction width: bf16-legal, no narrow lane slices


def _round_up(v, m):
    return ((v + m - 1) // m) * m


def gcn_kernel(a_ref, x_ref, w_ref, b_ref, out_ref):
    """Full GCN forward for one graph, all tiles resident in VMEM.

    a_ref   : [1, Np, Np]       bf16  D^-1/2 (A+I) D^-1/2 (pre-normalized)
    x_ref   : [1, Np, 128]      bf16  node features (zero padded)
    w_ref   : [4, 128, 128]     bf16  packed W1, W2, W3, Wc (zero padded)
    b_ref   : [4, 128]          f32   packed b1, b2, b3, bc (zero padded)
    out_ref : [1, 2, Np, 128]   f32   [0] = classifier logits, [1] = last h
    """
    a = a_ref[0]                                            # [Np, Np] bf16

    def gcn_layer(h_bf, li):
        # GCNConv: A_norm @ (h @ W) + b, then tanh (bias/tanh in f32).
        hw = jnp.dot(h_bf, w_ref[li], preferred_element_type=jnp.float32)
        ah = jnp.dot(a, hw.astype(jnp.bfloat16),
                     preferred_element_type=jnp.float32)
        return jnp.tanh(ah + b_ref[li:li + 1, :])           # [Np, 128] f32

    h = gcn_layer(x_ref[0], 0)
    h = gcn_layer(h.astype(jnp.bfloat16), 1)
    h = gcn_layer(h.astype(jnp.bfloat16), 2)

    # classifier: h @ Wc + bc (no adjacency, no tanh)
    logits = (jnp.dot(h.astype(jnp.bfloat16), w_ref[3],
                      preferred_element_type=jnp.float32)
              + b_ref[3:4, :])

    out_ref[0, 0, :, :] = logits
    out_ref[0, 1, :, :] = h


def _normalized_adjacency(x, edge_index):
    """Single-graph D^-1/2 (A+I) D^-1/2 (dense, f32)."""
    N = x.shape[0]
    src, dst = edge_index[0], edge_index[1]
    A = jnp.zeros((N, N), jnp.float32).at[dst, src].add(1.0)
    # Note: if edge_index already contains self-loops, A + I double-counts
    # the diagonal (same caveat as the reference dense construction).
    A_hat = A + jnp.eye(N, dtype=jnp.float32)
    dinv = jax.lax.rsqrt(A_hat.sum(axis=1))
    return dinv[:, None] * A_hat * dinv[None, :]


def gcn_forward(x, edge_index, params, num_classes):
    """GCN forward. x: [N, F] or [B, N, F] f32; edge_index: [2, E] or [B, 2, E]."""
    squeeze = (x.ndim == 2)
    if squeeze:
        x = x[None]
        edge_index = edge_index[None]

    B, N, F = x.shape
    w1, b1, w2, b2, w3, b3, wc, bc = params

    n_pad = _round_up(max(N, 16), 16)   # sublane-aligned (bf16) node count

    # --- glue: per-graph normalized adjacency, fully folded in the wrapper
    a_norm = jax.vmap(_normalized_adjacency)(x, edge_index)       # [B, N, N]

    # --- glue: zero-padding; MXU operands pre-cast to bf16
    a_p = (jnp.zeros((B, n_pad, n_pad), jnp.float32)
           .at[:, :N, :N].set(a_norm)).astype(jnp.bfloat16)
    x_p = (jnp.zeros((B, n_pad, K_PAD), jnp.float32)
           .at[:, :N, :F].set(jnp.asarray(x, jnp.float32))).astype(jnp.bfloat16)

    w_pack = (jnp.zeros((4, K_PAD, LANE), jnp.float32)
              .at[0, :F, :w1.shape[1]].set(w1)
              .at[1, :w2.shape[0], :w2.shape[1]].set(w2)
              .at[2, :w3.shape[0], :w3.shape[1]].set(w3)
              .at[3, :wc.shape[0], :wc.shape[1]].set(wc)
              ).astype(jnp.bfloat16)
    b_pack = (jnp.zeros((4, LANE), jnp.float32)
              .at[0, :b1.shape[0]].set(b1)
              .at[1, :b2.shape[0]].set(b2)
              .at[2, :b3.shape[0]].set(b3)
              .at[3, :bc.shape[0]].set(bc))

    # explicit VMEM budget: double-buffered per-graph blocks + shared weights
    a_blk = n_pad * n_pad * 2
    x_blk = n_pad * K_PAD * 2
    out_blk = 2 * n_pad * LANE * 4
    w_bytes = 4 * K_PAD * LANE * 2
    b_bytes = 4 * LANE * 4
    vmem_limit = int(min(100 << 20,
                         2 * (a_blk + x_blk + out_blk) + w_bytes + b_bytes
                         + (4 << 20)))

    res = pl.pallas_call(
        gcn_kernel,
        out_shape=jax.ShapeDtypeStruct((B, 2, n_pad, LANE), jnp.float32),
        grid=(B,),
        in_specs=[
            pl.BlockSpec((1, n_pad, n_pad), lambda g: (g, 0, 0)),
            pl.BlockSpec((1, n_pad, K_PAD), lambda g: (g, 0, 0)),
            pl.BlockSpec((4, K_PAD, LANE), lambda g: (0, 0, 0)),
            pl.BlockSpec((4, LANE), lambda g: (0, 0)),
        ],
        out_specs=pl.BlockSpec((1, 2, n_pad, LANE), lambda g: (g, 0, 0, 0)),
        compiler_params=pltpu.CompilerParams(
            dimension_semantics=("parallel",),
            vmem_limit_bytes=vmem_limit),
    )(a_p, x_p, w_pack, b_pack)

    # padded node rows / lanes (bias-only garbage) are sliced away here
    out = res[:, 0, :N, :num_classes]
    h = res[:, 1, :N, :2]
    if squeeze:
        out, h = out[0], h[0]
    return out, h


def gcn_reference(x, edge_index, params):
    """Pure-JAX f32 reference of the torch module's forward (single graph)."""
    w1, b1, w2, b2, w3, b3, wc, bc = params
    a_norm = _normalized_adjacency(x, edge_index)
    h = jnp.tanh(a_norm @ (x @ w1) + b1)
    h = jnp.tanh(a_norm @ (h @ w2) + b2)
    h = jnp.tanh(a_norm @ (h @ w3) + b3)
    return h @ wc + bc, h


def init_params(key, num_features, num_classes):
    """Deterministic synthetic parameters (same shapes as the torch module)."""
    def glorot(k, fan_in, fan_out):
        scale = jnp.sqrt(6.0 / (fan_in + fan_out))
        return jax.random.uniform(k, (fan_in, fan_out), jnp.float32, -scale, scale)

    ks = jax.random.split(key, 4)
    w1, b1 = glorot(ks[0], num_features, 4), jnp.zeros((4,), jnp.float32)
    w2, b2 = glorot(ks[1], 4, 4), jnp.zeros((4,), jnp.float32)
    w3, b3 = glorot(ks[2], 4, 2), jnp.zeros((2,), jnp.float32)
    wc, bc = glorot(ks[3], 2, num_classes), jnp.zeros((num_classes,), jnp.float32)
    return (w1, b1, w2, b2, w3, b3, wc, bc)


if __name__ == "__main__":
    num_features = 8
    num_classes = 4
    B = 8    # graphs batched over the grid ("parallel" axis)
    N = 16   # nodes per graph

    key = jax.random.PRNGKey(0)
    k_x, k_p = jax.random.split(key)

    # node features [B, N, F]
    x = jax.random.normal(k_x, (B, N, num_features), dtype=jnp.float32)

    # undirected ring graph per batch element -> edge_index [B, 2, 32]
    idx = jnp.arange(N, dtype=jnp.int32)
    nxt = (idx + 1) % N
    src = jnp.concatenate([idx, nxt])
    dst = jnp.concatenate([nxt, idx])
    edge_index = jnp.broadcast_to(jnp.stack([src, dst], axis=0)[None], (B, 2, 2 * N))

    params = init_params(k_p, num_features, num_classes)

    out, h = gcn_forward(x, edge_index, params, num_classes)
    jax.block_until_ready((out, h))

    assert out.shape == (B, N, num_classes) and h.shape == (B, N, 2)
    assert bool(jnp.all(jnp.isfinite(out))) and bool(jnp.all(jnp.isfinite(h)))

    # numerical check vs. f32 pure-JAX reference (bf16 MXU operands -> loose tol)
    out_ref, h_ref = jax.vmap(lambda xx, ee: gcn_reference(xx, ee, params))(x, edge_index)
    assert bool(jnp.allclose(out, out_ref, atol=7.5e-2, rtol=7.5e-2))
    assert bool(jnp.allclose(h, h_ref, atol=7.5e-2, rtol=7.5e-2))

    print("KERNEL_OK")
</pallas_src>

<mosaic_0001>
module attributes {stable_mosaic.version = 11 : i64} {
  func.func @gcn_kernel(%arg0: i32, %arg1: memref<1x16x16xbf16, #tpu.memory_space<vmem>>, %arg2: memref<1x16x128xbf16, #tpu.memory_space<vmem>>, %arg3: memref<4x128x128xbf16, #tpu.memory_space<vmem>>, %arg4: memref<4x128xf32, #tpu.memory_space<vmem>>, %arg5: memref<1x2x16x128xf32, #tpu.memory_space<vmem>>) attributes {dimension_semantics = [#tpu.dimension_semantics<parallel>], iteration_bounds = array<i64: 8>, scalar_prefetch = 0 : i64, scratch_operands = 0 : i64, tpu.core_type = #tpu.core_type<tc>, window_params = [{transform_indices = @transform_0, window_bounds = array<i64: 1, 16, 16>}, {transform_indices = @transform_1, window_bounds = array<i64: 1, 16, 128>}, {pipeline_mode = #tpu.pipeline_mode<synchronous>, transform_indices = @transform_2, window_bounds = array<i64: 4, 128, 128>}, {pipeline_mode = #tpu.pipeline_mode<synchronous>, transform_indices = @transform_3, window_bounds = array<i64: 4, 128>}, {transform_indices = @transform_4, window_bounds = array<i64: 1, 2, 16, 128>}]} {
    %c0 = arith.constant 0 : index
    %c0_0 = arith.constant 0 : index
    %c0_1 = arith.constant 0 : index
    %0 = vector.load %arg1[%c0, %c0_0, %c0_1] : memref<1x16x16xbf16, #tpu.memory_space<vmem>>, vector<1x16x16xbf16>
    %1 = vector.shape_cast %0 : vector<1x16x16xbf16> to vector<16x16xbf16>
    %c0_2 = arith.constant 0 : index
    %c0_3 = arith.constant 0 : index
    %c0_4 = arith.constant 0 : index
    %2 = vector.load %arg2[%c0_2, %c0_3, %c0_4] : memref<1x16x128xbf16, #tpu.memory_space<vmem>>, vector<1x16x128xbf16>
    %3 = vector.shape_cast %2 : vector<1x16x128xbf16> to vector<16x128xbf16>
    %c0_5 = arith.constant 0 : index
    %c0_6 = arith.constant 0 : index
    %c0_7 = arith.constant 0 : index
    %4 = vector.load %arg3[%c0_5, %c0_6, %c0_7] : memref<4x128x128xbf16, #tpu.memory_space<vmem>>, vector<1x128x128xbf16>
    %5 = vector.shape_cast %4 : vector<1x128x128xbf16> to vector<128x128xbf16>
    %cst = arith.constant dense<0.000000e+00> : vector<16x128xf32>
    %6 = tpu.matmul %3, %5, %cst {dimension_numbers = #tpu.dot_dimension_numbers<[1], [0], [0], [1], [0, 0, 1, 1], [], []>} : vector<16x128xbf16>, vector<128x128xbf16>, vector<16x128xf32> -> vector<16x128xf32>
    %7 = arith.truncf %6 : vector<16x128xf32> to vector<16x128xbf16>
    %cst_8 = arith.constant dense<0.000000e+00> : vector<16x128xf32>
    %8 = tpu.matmul %1, %7, %cst_8 {dimension_numbers = #tpu.dot_dimension_numbers<[1], [0], [0], [1], [0, 0, 1, 1], [], []>} : vector<16x16xbf16>, vector<16x128xbf16>, vector<16x128xf32> -> vector<16x128xf32>
    %c0_9 = arith.constant 0 : index
    %c0_10 = arith.constant 0 : index
    %9 = vector.load %arg4[%c0_9, %c0_10] : memref<4x128xf32, #tpu.memory_space<vmem>>, vector<1x128xf32>
    %10 = vector.broadcast %9 : vector<1x128xf32> to vector<16x128xf32>
    %11 = arith.addf %8, %10 : vector<16x128xf32>
    %12 = math.tanh %11 : vector<16x128xf32>
    %13 = arith.truncf %12 : vector<16x128xf32> to vector<16x128xbf16>
    %c1 = arith.constant 1 : index
    %c0_11 = arith.constant 0 : index
    %c0_12 = arith.constant 0 : index
    %14 = vector.load %arg3[%c1, %c0_11, %c0_12] : memref<4x128x128xbf16, #tpu.memory_space<vmem>>, vector<1x128x128xbf16>
    %15 = vector.shape_cast %14 : vector<1x128x128xbf16> to vector<128x128xbf16>
    %cst_13 = arith.constant dense<0.000000e+00> : vector<16x128xf32>
    %16 = tpu.matmul %13, %15, %cst_13 {dimension_numbers = #tpu.dot_dimension_numbers<[1], [0], [0], [1], [0, 0, 1, 1], [], []>} : vector<16x128xbf16>, vector<128x128xbf16>, vector<16x128xf32> -> vector<16x128xf32>
    %17 = arith.truncf %16 : vector<16x128xf32> to vector<16x128xbf16>
    %cst_14 = arith.constant dense<0.000000e+00> : vector<16x128xf32>
    %18 = tpu.matmul %1, %17, %cst_14 {dimension_numbers = #tpu.dot_dimension_numbers<[1], [0], [0], [1], [0, 0, 1, 1], [], []>} : vector<16x16xbf16>, vector<16x128xbf16>, vector<16x128xf32> -> vector<16x128xf32>
    %c1_15 = arith.constant 1 : index
    %c0_16 = arith.constant 0 : index
    %19 = vector.load %arg4[%c1_15, %c0_16] : memref<4x128xf32, #tpu.memory_space<vmem>>, vector<1x128xf32>
    %20 = vector.broadcast %19 : vector<1x128xf32> to vector<16x128xf32>
    %21 = arith.addf %18, %20 : vector<16x128xf32>
    %22 = math.tanh %21 : vector<16x128xf32>
    %23 = arith.truncf %22 : vector<16x128xf32> to vector<16x128xbf16>
    %c2 = arith.constant 2 : index
    %c0_17 = arith.constant 0 : index
    %c0_18 = arith.constant 0 : index
    %24 = vector.load %arg3[%c2, %c0_17, %c0_18] : memref<4x128x128xbf16, #tpu.memory_space<vmem>>, vector<1x128x128xbf16>
    %25 = vector.shape_cast %24 : vector<1x128x128xbf16> to vector<128x128xbf16>
    %cst_19 = arith.constant dense<0.000000e+00> : vector<16x128xf32>
    %26 = tpu.matmul %23, %25, %cst_19 {dimension_numbers = #tpu.dot_dimension_numbers<[1], [0], [0], [1], [0, 0, 1, 1], [], []>} : vector<16x128xbf16>, vector<128x128xbf16>, vector<16x128xf32> -> vector<16x128xf32>
    %27 = arith.truncf %26 : vector<16x128xf32> to vector<16x128xbf16>
    %cst_20 = arith.constant dense<0.000000e+00> : vector<16x128xf32>
    %28 = tpu.matmul %1, %27, %cst_20 {dimension_numbers = #tpu.dot_dimension_numbers<[1], [0], [0], [1], [0, 0, 1, 1], [], []>} : vector<16x16xbf16>, vector<16x128xbf16>, vector<16x128xf32> -> vector<16x128xf32>
    %c2_21 = arith.constant 2 : index
    %c0_22 = arith.constant 0 : index
    %29 = vector.load %arg4[%c2_21, %c0_22] : memref<4x128xf32, #tpu.memory_space<vmem>>, vector<1x128xf32>
    %30 = vector.broadcast %29 : vector<1x128xf32> to vector<16x128xf32>
    %31 = arith.addf %28, %30 : vector<16x128xf32>
    %32 = math.tanh %31 : vector<16x128xf32>
    %33 = arith.truncf %32 : vector<16x128xf32> to vector<16x128xbf16>
    %c3 = arith.constant 3 : index
    %c0_23 = arith.constant 0 : index
    %c0_24 = arith.constant 0 : index
    %34 = vector.load %arg3[%c3, %c0_23, %c0_24] : memref<4x128x128xbf16, #tpu.memory_space<vmem>>, vector<1x128x128xbf16>
    %35 = vector.shape_cast %34 : vector<1x128x128xbf16> to vector<128x128xbf16>
    %cst_25 = arith.constant dense<0.000000e+00> : vector<16x128xf32>
    %36 = tpu.matmul %33, %35, %cst_25 {dimension_numbers = #tpu.dot_dimension_numbers<[1], [0], [0], [1], [0, 0, 1, 1], [], []>} : vector<16x128xbf16>, vector<128x128xbf16>, vector<16x128xf32> -> vector<16x128xf32>
    %c3_26 = arith.constant 3 : index
    %c0_27 = arith.constant 0 : index
    %37 = vector.load %arg4[%c3_26, %c0_27] : memref<4x128xf32, #tpu.memory_space<vmem>>, vector<1x128xf32>
    %38 = vector.broadcast %37 : vector<1x128xf32> to vector<16x128xf32>
    %39 = arith.addf %36, %38 : vector<16x128xf32>
    %c0_28 = arith.constant 0 : index
    %c0_29 = arith.constant 0 : index
    %c0_30 = arith.constant 0 : index
    %c0_31 = arith.constant 0 : index
    %40 = vector.load %arg5[%c0_28, %c0_29, %c0_30, %c0_31] : memref<1x2x16x128xf32, #tpu.memory_space<vmem>>, vector<1x1x16x128xf32>
    %41 = vector.shape_cast %40 : vector<1x1x16x128xf32> to vector<16x128xf32>
    %42 = vector.shape_cast %39 : vector<16x128xf32> to vector<1x1x16x128xf32>
    tpu.vector_store %arg5[%c0_28, %c0_29, %c0_30, %c0_31], %42 {strides = array<i32>} : memref<1x2x16x128xf32, #tpu.memory_space<vmem>>, vector<1x1x16x128xf32>,
    %c0_32 = arith.constant 0 : index
    %c1_33 = arith.constant 1 : index
    %c0_34 = arith.constant 0 : index
    %c0_35 = arith.constant 0 : index
    %43 = vector.load %arg5[%c0_32, %c1_33, %c0_34, %c0_35] : memref<1x2x16x128xf32, #tpu.memory_space<vmem>>, vector<1x1x16x128xf32>
    %44 = vector.shape_cast %43 : vector<1x1x16x128xf32> to vector<16x128xf32>
    %45 = vector.shape_cast %32 : vector<16x128xf32> to vector<1x1x16x128xf32>
    tpu.vector_store %arg5[%c0_32, %c1_33, %c0_34, %c0_35], %45 {strides = array<i32>} : memref<1x2x16x128xf32, #tpu.memory_space<vmem>>, vector<1x1x16x128xf32>,
    return
  }
  func.func @transform_0(%arg0: i32) -> (i32, i32, i32) {
    %c0_i32 = arith.constant 0 : i32
    %c0_i32_0 = arith.constant 0 : i32
    %c0_i32_1 = arith.constant 0 : i32
    return %arg0, %c0_i32, %c0_i32_0 : i32, i32, i32
  }
  func.func @transform_1(%arg0: i32) -> (i32, i32, i32) {
    %c0_i32 = arith.constant 0 : i32
    %c0_i32_0 = arith.constant 0 : i32
    %c0_i32_1 = arith.constant 0 : i32
    return %arg0, %c0_i32, %c0_i32_0 : i32, i32, i32
  }
  func.func @transform_2(%arg0: i32) -> (i32, i32, i32) {
    %c0_i32 = arith.constant 0 : i32
    %c0_i32_0 = arith.constant 0 : i32
    %c0_i32_1 = arith.constant 0 : i32
    %c0_i32_2 = arith.constant 0 : i32
    return %c0_i32, %c0_i32_0, %c0_i32_1 : i32, i32, i32
  }
  func.func @transform_3(%arg0: i32) -> (i32, i32) {
    %c0_i32 = arith.constant 0 : i32
    %c0_i32_0 = arith.constant 0 : i32
    %c0_i32_1 = arith.constant 0 : i32
    return %c0_i32, %c0_i32_0 : i32, i32
  }
  func.func @transform_4(%arg0: i32) -> (i32, i32, i32, i32) {
    %c0_i32 = arith.constant 0 : i32
    %c0_i32_0 = arith.constant 0 : i32
    %c0_i32_1 = arith.constant 0 : i32
    %c0_i32_2 = arith.constant 0 : i32
    return %arg0, %c0_i32, %c0_i32_0, %c0_i32_1 : i32, i32, i32, i32
  }
}

</mosaic_0001>

<bundles_post_ra>
// kernel: tpu_custom_call.1
= control target key start
LH: loop header
LB: loop body
LE: loop exit
PB: predicated region body
PF: predicated region fallthrough
CT: control target
= control target key end

     0   :  { %s1831_s0 = inlined_call_operand.hbm [shape: bf16[8,16,16], index: 0, kind: input, shape index: {}]   ;;  %s1832_s1 = inlined_call_operand.hbm [shape: bf16[8,16,128], index: 1, kind: input, shape index: {}]   ;;  %s1833_s2 = inlined_call_operand.hbm [shape: bf16[4,128,128], index: 2, kind: input, shape index: {}]   ;;  %s1834_s3 = inlined_call_operand.vmem [shape: f32[4,128], index: 3, kind: input, shape index: {}]   ;;  %s1835_s4 = inlined_call_operand.hbm [shape: f32[8,2,16,128], index: 4, kind: output, shape index: {}]  }
   0x1   :  { %1843 = sst [smem:[#allocation14_spill]] %s1831_s0 }
   0x2   :  { %1844 = sst [smem:[#allocation15_spill]] %s1833_s2 }
   0x3   :  { %9 = vsyncpa [#allocation3], 0 }
   0x4   :  { %11 = vsyncpa [#allocation3 + $0x1], 0 }
   0x5   :  { %12 = vsyncpa [#allocation6], 0 }
   0x6   :  { %14 = vsyncpa [#allocation6 + $0x1], 0 }
   0x7   :  { %15 = vsyncpa [#allocation4], 0 }
   0x8   :  { %17 = vsyncpa [#allocation4 + $0x1], 0  ;;  %s1511_s15 = smov 0   ;;  %s1513_s16 = smov 0  }
   0x9   :  { %s1515_s17 = smov 0   ;;  %s1517_s18 = smov 0  }
   0xa LB: > { %s1532_s19 = sadd.s32 4294967295, %s1474_s18   ;;  %s992_s20 = sadd.s32 4294967294, %s1474_s18   ;;  %s1474_s18 = sphi %s1517_s18, %s1866_s18   ;;  %s1470_s17 = sphi %s1515_s17, %s1865_s17   ;;  %s1466_s16 = sphi %s1513_s16, %s1864_s16   ;;  %s1462_s15 = sphi %s1511_s15, %s1863_s15  }
   0xb   : > { %p43_p0 = scmp.ne.s32.totalorder %s1466_s16, %s1462_s15  ;;  %p1836_p1 = scmp.eq.s32.totalorder %s1532_s19, 0 }
   0xc   : > { %p141_p3 = scmp.eq.s32.totalorder %s992_s20, 7  ;;  %p993_p5 = scmp.ge.s32.totalorder %s1474_s18, 1 }
   0xd   : > { %p1541_p4 = por %p1836_p1, %p43_p0  ;;  %p148_p7 = scmp.lt.s32.totalorder %s1474_s18, 9 }
   0xe   : > { %p1546_p6 = por %p141_p3, %p43_p0  ;;  %s1476_s24 = smov [#allocation7]  }
   0xf   : > { %s1845_s21 = scalar_select %p1541_p4, 1, 0 }
  0x10   : > { %s1846_s22 = scalar_select %p1546_p6, 1, 0 }
  0x11   : > { %p1551_p8 = pnand %p993_p5, %p148_p7  ;;  %s160_s25 = sshll.u32 %s1476_s24, 4  ;;  %s161_s25 = int_to_ptr.vmem [resolvable:$true] %s160_s25 }
  0x12   : > { %s1564_s27 = sadd.s32 1, %s1474_s18   ;;  %s30_s28 = sadd.s32 1, %s1470_s17 }
  0x13   : > { %s1847_s23 = scalar_select %p1551_p8, 1, 0 }
  0x14   : > { %p1208_p9 = pneg %p1551_p8  ;;  %s27_s29 = ssub.s32 %s1474_s18, %s1564_s27 }
  0x15   : > { %s1849_s2 = sld [smem:[#allocation15_spill]] }
  0x16   : > { %p1559_p10 = pnand %p1208_p9, %p1836_p1 }
  0x18   : > { %p1314_p12 = pneg %p1559_p10 }
  0x1b   : > { %s1312_s6 = scalar_lea.hbm %s1849_s2, 4096 }
  0x1c   : > { %p1313_p11 = scmp.ne.s32.totalorder %s1849_s2, %s1312_s6  ;;  %p1319_p3 = scmp.lt.u32.totalorder %s1312_s6, %s1849_s2 }
  0x1e   : > { %p1315_p13 = pnand %p1314_p12, %p1313_p11 }
  0x20   : > { %p1316_p0 = pneg %p1315_p13 }
  0x22   : > { %p1321_p5 = pnand %p1319_p3, %p1316_p0 }
  0x24   : > { %1324 = shalt.err (!%p1321_p5)
}
  0x25   : > { %s1325_s11 = scalar_lea.vmem %s161_s25, 4096  ;;  %p1333_p2 = scmp.lt.s32.totalorder %s161_s25, %s161_s25 }
  0x26   : > { %p1326_p7 = scmp.ne.s32.totalorder %s161_s25, %s1325_s11  ;;  %p1334_p6 = scmp.lt.s32.totalorder %s1325_s11, %s1325_s11 }
  0x28   : > { %p1328_p9 = pnand %p1326_p7, %p1314_p12  ;;  %p1335_p4 = por %p1334_p6, %p1333_p2 }
  0x2a   : > { %p1329_p1 = pneg %p1328_p9 }
  0x2c   : > { %p1336_p8 = pnand %p1335_p4, %p1329_p1 }
  0x2e   : > { %1339 = shalt.err (!%p1336_p8)
}
  0x2f   : > { %s1839_s12 = smov 64   ;;  %s1841_s13 = smov 4  }
  0x30   : > { %1211 = dma.hbm_to_vmem [thread:$0]  (!%p1559_p10), %s1849_s2, 4096, %s161_s25, [#allocation6], %s1839_s12, %s1839_s12, %s1841_s13  }
  0x31   : > { %p28_p1 = scmp.eq.s32.totalorder %s27_s29, 0  ;;  %p37_p2 = scmp.ne.s32.totalorder %s1470_s17, %s1466_s16 }
  0x32   : > { %p38_p4 = scmp.eq.s32.totalorder %s1474_s18, 0  ;;  %p1224_p6 = scmp.lt.s32.totalorder %s1474_s18, 8 }
  0x33   : > { %s1593_s24 = scalar_select %p28_p1, %s1470_s17, %s30_s28  }
  0x34   : > { %p39_p8 = por %p38_p4, %p37_p2  ;;  %p1851_p11 = scmp.eq.s32.totalorder %s1532_s19, 7 }
  0x35   : > { %1850 = sst [smem:[#allocation13_spill]] %s1593_s24  ;;  %s177_s26 = sand.u32 1, %s1470_s17  }
  0x36   : > { %p1597_p12 = por %p1851_p11, %p37_p2  ;;  %s1055_s5 = sshll.u32 %s1474_s18, 7 }
  0x37   : > { %s1603_s6 = sshll.u32 %s177_s26, 3  ;;  %s1853_s0 = sld [smem:[#allocation14_spill]] }
  0x38   : > { %s181_s28 = scalar_lea.vmem [#allocation2], %s1603_s6  ;;  %p1611_p10 = pnand %p1224_p6, %p39_p8 }
  0x39   : > { %s188_s29 = sshll.u32 %s181_s28, 4  ;;  %s1620_s14 = scalar_lea.hbm %s1832_s1, %s1055_s5  ;;  %s1615_s29 = int_to_ptr.vmem [resolvable:$true] %s188_s29 }
  0x3a   : > { %s1622_s20 = scalar_lea.sflag [#allocation3], %s177_s26  ;;  %p1342_p0 = pneg %p1611_p10 }
  0x3d   : > { %s1608_s25 = scalar_lea.hbm %s1853_s0, %s1055_s5  ;;  %s1345_s12 = scalar_lea.hbm %s1853_s0, 1024 }
  0x3e   : > { %s1340_s7 = scalar_lea.hbm %s1608_s25, 128  ;;  %p1346_p7 = scmp.lt.u32.totalorder %s1608_s25, %s1853_s0 }
  0x3f   : > { %p1341_p13 = scmp.ne.s32.totalorder %s1608_s25, %s1340_s7  ;;  %p1347_p9 = scmp.lt.u32.totalorder %s1345_s12, %s1340_s7 }
  0x40   : > { %p1349_p2 = scmp.lt.u32.totalorder %s1340_s7, %s1608_s25 }
  0x41   : > { %p1343_p3 = pnand %p1342_p0, %p1341_p13  ;;  %p1348_p1 = por %p1347_p9, %p1346_p7 }
  0x43   : > { %p1344_p5 = pneg %p1343_p3  ;;  %p1350_p4 = por %p1349_p2, %p1348_p1 }
  0x45   : > { %p1351_p6 = pnand %p1350_p4, %p1344_p5 }
  0x47   : > { %1354 = shalt.err (!%p1351_p6)
}
  0x48   : > { %s1355_s26 = scalar_lea.vmem %s1615_s29, 128  ;;  %s1479_s5 = smov [#allocation2]  }
  0x49   : > { %p1356_p8 = scmp.ne.s32.totalorder %s1615_s29, %s1355_s26  ;;  %s1360_s10 = sshll.u32 %s1479_s5, 4  ;;  %s1361_s10 = int_to_ptr.vmem [resolvable:$false] %s1360_s10 }
  0x4a   : > { %s1362_s2 = scalar_lea.vmem %s1361_s10, 256  ;;  %p1363_p3 = scmp.lt.s32.totalorder %s1615_s29, %s1361_s10 }
  0x4b   : > { %p1358_p11 = pnand %p1356_p8, %p1342_p0  ;;  %p1364_p7 = scmp.lt.s32.totalorder %s1362_s2, %s1355_s26 }
  0x4d   : > { %p1359_p13 = pneg %p1358_p11  ;;  %p1365_p9 = por %p1364_p7, %p1363_p3 }
  0x4f   : > { %p1366_p1 = pnand %p1365_p9, %p1359_p13 }
  0x51   : > { %1369 = shalt.err (!%p1366_p1)
}
  0x52   : > { %s1855_s12 = smov 4   ;;  %s1856_s13 = smov 64  }
  0x53   : > { %1215 = dma.hbm_to_vmem [thread:$0]  (!%p1611_p10), %s1608_s25, 128, %s1615_s29, %s1622_s20, %s1856_s13, %s1856_s13, %s1855_s12  }
  0x54   : > { %s202_s11 = scalar_lea.vmem [#allocation5], %s1603_s6  ;;  %s198_s8 = sand.u32 1, %s1474_s18  }
  0x55   : > { %s209_s7 = sshll.u32 %s202_s11, 4  ;;  %s1657_s28 = scalar_lea.sflag [#allocation6], %s198_s8  ;;  %s1655_s7 = int_to_ptr.vmem [resolvable:$true] %s209_s7 }
  0x56   : > { %s1370_s26 = scalar_lea.hbm %s1620_s14, 128  ;;  %s1375_s2 = scalar_lea.hbm %s1832_s1, 1024 }
  0x57   : > { %p1371_p5 = scmp.ne.s32.totalorder %s1620_s14, %s1370_s26  ;;  %p1376_p6 = scmp.lt.u32.totalorder %s1620_s14, %s1832_s1 }
  0x58   : > { %p1377_p8 = scmp.lt.u32.totalorder %s1375_s2, %s1370_s26  ;;  %p1379_p13 = scmp.lt.u32.totalorder %s1370_s26, %s1620_s14 }
  0x59   : > { %p1373_p2 = pnand %p1371_p5, %p1342_p0 }
  0x5a   : > { %p1378_p11 = por %p1377_p8, %p1376_p6 }
  0x5b   : > { %p1374_p4 = pneg %p1373_p2 }
  0x5c   : > { %p1380_p3 = por %p1379_p13, %p1378_p11 }
  0x5e   : > { %p1381_p7 = pnand %p1380_p3, %p1374_p4 }
  0x60   : > { %1384 = shalt.err (!%p1381_p7)
}
  0x61   : > { %s1385_s6 = scalar_lea.vmem %s1655_s7, 128  ;;  %s1480_s25 = smov [#allocation5]  }
  0x62   : > { %p1386_p9 = scmp.ne.s32.totalorder %s1655_s7, %s1385_s6  ;;  %s1390_s29 = sshll.u32 %s1480_s25, 4  ;;  %s1391_s29 = int_to_ptr.vmem [resolvable:$false] %s1390_s29 }
  0x63   : > { %s1392_s0 = scalar_lea.vmem %s1391_s29, 256  ;;  %p1393_p2 = scmp.lt.s32.totalorder %s1655_s7, %s1391_s29 }
  0x64   : > { %p1388_p1 = pnand %p1386_p9, %p1342_p0  ;;  %p1394_p6 = scmp.lt.s32.totalorder %s1392_s0, %s1385_s6 }
  0x66   : > { %p1389_p5 = pneg %p1388_p1  ;;  %p1395_p8 = por %p1394_p6, %p1393_p2 }
  0x68   : > { %p1396_p11 = pnand %p1395_p8, %p1389_p5 }
  0x6a   : > { %1399 = shalt.err (!%p1396_p11)
}
  0x6b   : > { %1218 = dma.hbm_to_vmem [thread:$0]  (!%p1611_p10), %s1620_s14, 128, %s1655_s7, %s1657_s28, %s1856_s13, %s1856_s13, %s1855_s12  }
  0x6c   : > { %p1857_p0 = scmp.ne.s32.totalorder %s1847_s23, 0 }
  0x6d   : > { %s1689_s24 = sand.u32 (!%p1857_p0), 1, %s1466_s16   ;;  %p1858_p4 = scmp.ne.s32.totalorder (!%p1857_p0), %s1845_s21, 0 }
  0x6e   : > { %221 = sbr.rel (%p1857_p0) target bundleno = 1733 (0x6c5), region = 36  ;;  %s1003_s20 = sshll.u32 (!%p1857_p0), %s1689_s24, 3 }
  0x6f   : > { %s224_s11 = scalar_lea.sflag (!%p1857_p0), [#allocation3], %s1689_s24  ;;  %s1693_s8 = scalar_lea.vmem (!%p1857_p0), [#allocation2], %s1003_s20 }
  0x75   : > { %1445 = dma.done.wait (%p1858_p4), %s224_s11, 128  }
  0x76   : > { %1447 = vsyncadd (%p1858_p4), %s224_s11, 4294967168  ;;  %s232_s9 = sand.u32 1, %s1532_s19   ;;  %s1700_s14 = scalar_lea.vmem [#allocation5], %s1003_s20 }
  0x77   : > { %s233_s23 = scalar_lea.sflag [#allocation6], %s232_s9 }
  0x78   : > { %1449 = dma.done.wait (%p1858_p4), %s233_s23, 128  }
  0x79   : > { %1451 = vsyncadd (%p1858_p4), %s233_s23, 4294967168  ;;  %p1859_p10 = scmp.eq.s32.totalorder %s1532_s19, 0 }
  0x7b   : > { %1453 = dma.done.wait (%p1859_p10), [#allocation6], 4096   ;;  %p1860_p13 = pmov %p1859_p10 }
  0x7c   : > { %v1481_v0 = vmov 0.0   ;;  %vm1482_vm0 = vmmov 0   ;;  %v1266_v1 = vld [vmem:[#allocation7] sm:$0xff]   ;;  %v1267_v2 = vld [vmem:[#allocation7 + $0x8] sm:$0xff]   ;;  %v1268_v3 = vld [vmem:[#allocation7 + $0x10] sm:$0xff]   ;;  %vm397_vm1 = vcmask 130048  }
  0x7d   : > { %1455 = vsyncadd (%p1860_p13), [#allocation6], 4294963200  ;;  %1100 = vmatprep.subr.bf16.mxu0 %v1481_v0  ;;  %1116 = vmatprep.mubr.msk.bf16.mxu0 %vm1482_vm0, %v1481_v0  ;;  %v1269_v4 = vld [vmem:[#allocation7 + $0x18] sm:$0xff]   ;;  %v1270_v5 = vld [vmem:[#allocation7 + $0x20] sm:$0xff]   ;;  %s1006_s5 = sshll.u32 %s1689_s24, 5  ;;  %s1057_s29 = sshll.u32 %s1532_s19, 9 }
  0x7e   : > { %1120 = vmatprep.subr.bf16.mxu1 %v1481_v0  ;;  %1122 = vmatprep.mubr.msk.bf16.mxu1 %vm1482_vm0, %v1481_v0  ;;  %v1271_v6 = vld [vmem:[#allocation7 + $0x28] sm:$0xff]   ;;  %v1272_v7 = vld [vmem:[#allocation7 + $0x30] sm:$0xff]   ;;  %v1273_v8 = vld [vmem:[#allocation7 + $0x38] sm:$0xff]   ;;  %s269_s10 = scalar_lea.vmem [#allocation8], %s1006_s5  ;;  %s1788_s11 = scalar_lea.hbm %s1835_s4, %s1057_s29 }
  0x7f   : > { %1101 = vmatpush3.bf16.msra.mxu0 %v1266_v1  ;;  %v1274_v9 = vld [vmem:[%s1700_s14] sm:$0xff]   ;;  %v1728_v15 = vld [vmem:[%s1693_s8] sm:$0xff]   ;;  %s887_s25 = sshll.u32 %s269_s10, 4  ;;  %s874_s8 = scalar_lea.sflag [#allocation4], %s1689_s24  ;;  %s1783_s25 = int_to_ptr.vmem [resolvable:$true] %s887_s25 }
  0x80   : > { %1102 = vmatprep.subr.bf16.mxu0 %v1481_v0  ;;  %v1276_v16 = vld [vmem:[#allocation7 + $0x40] sm:$0xff]   ;;  %v1277_v17 = vld [vmem:[#allocation7 + $0x48] sm:$0xff]   ;;  %v1278_v18 = vld [vmem:[#allocation7 + $0x50] sm:$0xff]   ;;  %s1400_s19 = scalar_lea.vmem %s1783_s25, 512  ;;  %s1483_s9 = smov [#allocation8]  }
  0x81   : > { %v1279_v19 = vld [vmem:[#allocation7 + $0x58] sm:$0xff]   ;;  %v1280_v20 = vld [vmem:[#allocation7 + $0x60] sm:$0xff]   ;;  %v1281_v21 = vld [vmem:[#allocation7 + $0x68] sm:$0xff]   ;;  %p1401_p3 = scmp.ne.s32.totalorder %s1783_s25, %s1400_s19  ;;  %s1404_s23 = sshll.u32 %s1483_s9, 4  ;;  %s1405_s23 = int_to_ptr.vmem [resolvable:$false] %s1404_s23 }
  0x82   : > { %v1282_v22 = vld [vmem:[#allocation7 + $0x70] sm:$0xff]   ;;  %v1283_v23 = vld [vmem:[#allocation7 + $0x78] sm:$0xff]   ;;  %v1016_v24 = vld [vmem:[%s1834_s3] ss:$0 sm:$0xff]  ;;  %s1406_s14 = scalar_lea.vmem %s1405_s23, 1024  ;;  %p1407_p1 = scmp.lt.s32.totalorder %s1783_s25, %s1405_s23 }
  0x83   : > { %1103 = vmatpush3.bf16.msra.mxu0 %v1267_v2  ;;  %v1284_v39 = vld [vmem:[#allocation7 + $0x80] sm:$0xff]   ;;  %v1285_v40 = vld [vmem:[#allocation7 + $0x88] sm:$0xff]   ;;  %v1286_v41 = vld [vmem:[#allocation7 + $0x90] sm:$0xff]   ;;  %p1402_p7 = pnand %p1401_p3, %p1597_p12  ;;  %p1408_p5 = scmp.lt.s32.totalorder %s1406_s14, %s1400_s19 }
  0x84   : > { %1104 = vmatprep.subr.bf16.mxu0 %v1481_v0  ;;  %v1287_v42 = vld [vmem:[#allocation7 + $0x98] sm:$0xff]   ;;  %v1288_v43 = vld [vmem:[#allocation7 + $0xa0] sm:$0xff]   ;;  %v1289_v44 = vld [vmem:[#allocation7 + $0xa8] sm:$0xff]  }
  0x85   : > { %v1290_v45 = vld [vmem:[#allocation7 + $0xb0] sm:$0xff]   ;;  %v1291_v46 = vld [vmem:[#allocation7 + $0xb8] sm:$0xff]   ;;  %v1027_v47 = vld [vmem:[%s1834_s3 + $0x1] ss:$0 sm:$0xff]  ;;  %p1403_p9 = pneg %p1402_p7  ;;  %p1409_p2 = por %p1408_p5, %p1407_p1 }
  0x86   : > { %v1292_v62 = vld [vmem:[#allocation7 + $0xc0] sm:$0xff]   ;;  %v1293_v63 = vld [vmem:[#allocation7 + $0xc8] sm:$0xff]   ;;  %v1294_v1 = vld [vmem:[#allocation7 + $0xd0] sm:$0xff]  }
  0x87   : > { %1105 = vmatpush3.bf16.msra.mxu0 %v1268_v3  ;;  %v1295_v2 = vld [vmem:[#allocation7 + $0xd8] sm:$0xff]   ;;  %v1296_v3 = vld [vmem:[#allocation7 + $0xe0] sm:$0xff]   ;;  %p1410_p6 = pnand %p1409_p2, %p1403_p9 }
  0x88   : > { %1106 = vmatprep.subr.bf16.mxu0 %v1481_v0 }
  0x8b   : > { %1107 = vmatpush3.bf16.msra.mxu0 %v1269_v4  ;;  %v1297_v4 = vld [vmem:[#allocation7 + $0xe8] sm:$0xff]  }
  0x8c   : > { %1108 = vmatprep.subr.bf16.mxu0 %v1481_v0 }
  0x8f   : > { %1109 = vmatpush3.bf16.msra.mxu0 %v1270_v5  ;;  %v1298_v5 = vld [vmem:[#allocation7 + $0xf0] sm:$0xff]  }
  0x90   : > { %1110 = vmatprep.subr.bf16.mxu0 %v1481_v0 }
  0x93   : > { %1111 = vmatpush3.bf16.msra.mxu0 %v1271_v6  ;;  %v1299_v6 = vld [vmem:[#allocation7 + $0xf8] sm:$0xff]  }
  0x94   : > { %1112 = vmatprep.subr.bf16.mxu0 %v1481_v0 }
  0x97   : > { %1113 = vmatpush3.bf16.msra.mxu0 %v1272_v7  ;;  %v1037_v7 = vld [vmem:[%s1834_s3 + $0x2] ss:$0 sm:$0xff] }
  0x98   : > { %1114 = vmatprep.subr.bf16.mxu0 %v1481_v0 }
  0x9b   : > { %1115 = vmatpush3.bf16.msra.mxu0 %v1273_v8 }
  0x9c   : > { %1172 = vmatprep.subr.bf16.mxu0 %v1481_v0 }
  0x9e   : > { %1117 = vmatmul.mubr.bf16.vlgmr.msra.gmra.mrb[0].mxu0 %v1274_v9 }
  0x9f   : > { %1174 = vmatprep.mubr.msk.bf16.mxu0 %vm1482_vm0, %v1481_v0 }
 0x171   : > { %v379_v10 = vpop.f32.mrb[0].mxu0 }
 0x172   : > { %v1118_v11 = vpop.f32.mrb[1].mxu0 }
 0x173   : > { %v382_v12 = vpop.f32.mrb[2].mxu0 }
 0x174   : > { %v386_v13 = vpack.c.bf16 %v382_v12, %v379_v10  ;;  %v1119_v14 = vpop.f32.mrb[3].mxu0 }
 0x176   : > { %1121 = vmatpush3.bf16.msra.mxu1 %v386_v13 }
 0x177   : > { %1126 = vmatprep.subr.bf16.mxu1 %v1481_v0 }
 0x179   : > { %1123 = vmatmul.mubr.msk.bf16.vlgmr.msra.gmra.mrb[0].mxu1 %vm397_vm1, %v1728_v15 }
 0x17a   : > { %1127 = vmatpush3.bf16.msra.mxu1 %v1276_v16  ;;  %1142 = vmatprep.mubr.msk.bf16.mxu1 %vm1482_vm0, %v1481_v0  ;;  %v1039_v16 = vld [vmem:[%s1834_s3 + $0x3] ss:$0 sm:$0xff] }
 0x17b   : > { %1128 = vmatprep.subr.bf16.mxu1 %v1481_v0 }
 0x17e   : > { %1129 = vmatpush3.bf16.msra.mxu1 %v1277_v17 }
 0x17f   : > { %1130 = vmatprep.subr.bf16.mxu1 %v1481_v0 }
 0x182   : > { %1131 = vmatpush3.bf16.msra.mxu1 %v1278_v18 }
 0x183   : > { %1132 = vmatprep.subr.bf16.mxu1 %v1481_v0 }
 0x186   : > { %1133 = vmatpush3.bf16.msra.mxu1 %v1279_v19 }
 0x187   : > { %1134 = vmatprep.subr.bf16.mxu1 %v1481_v0 }
 0x18a   : > { %1135 = vmatpush3.bf16.msra.mxu1 %v1280_v20 }
 0x18b   : > { %1136 = vmatprep.subr.bf16.mxu1 %v1481_v0 }
 0x18e   : > { %1137 = vmatpush3.bf16.msra.mxu1 %v1281_v21 }
 0x18f   : > { %1138 = vmatprep.subr.bf16.mxu1 %v1481_v0 }
 0x192   : > { %1139 = vmatpush3.bf16.msra.mxu1 %v1282_v22 }
 0x193   : > { %1140 = vmatprep.subr.bf16.mxu1 %v1481_v0 }
 0x196   : > { %1141 = vmatpush3.bf16.msra.mxu1 %v1283_v23 }
 0x197   : > { %1146 = vmatprep.subr.bf16.mxu1 %v1481_v0 }
 0x24c   : > { %v435_v25 = vpop.f32.mrb[0].mxu1 }
 0x24d   : > { %v436_v26 = vadd.f32 %v1016_v24, %v435_v25  ;;  %v1124_v27 = vpop.f32.mrb[1].mxu1 }
 0x24e   : > { %v438_v28 = vpop.f32.mrb[2].mxu1 }
 0x24f   : > { %v439_v29 = vadd.f32 %v1016_v24, %v438_v28  ;;  %v1125_v30 = vpop.f32.mrb[3].mxu1  ;;  %1300 = vtanh.f32 %v436_v26 }
 0x251   : > { %1302 = vtanh.f32 %v439_v29 }
 0x259   : > { %v1301_v31 = vpop.eup %1300 }
 0x25b   : > { %v1303_v32 = vpop.eup %1302 }
 0x25c   : > { %v444_v33 = vpack.c.bf16 %v1303_v32, %v1301_v31 }
 0x25e   : > { %1143 = vmatmul.mubr.bf16.vlgmr.msra.gmra.mrb[4].mxu1 %v444_v33 }
 0x25f   : > { %1148 = vmatprep.mubr.msk.bf16.mxu1 %vm1482_vm0, %v1481_v0 }
 0x331   : > { %v544_v34 = vpop.f32.mrb[4].mxu1 }
 0x332   : > { %v1144_v35 = vpop.f32.mrb[5].mxu1 }
 0x333   : > { %v547_v36 = vpop.f32.mrb[6].mxu1 }
 0x334   : > { %v551_v37 = vpack.c.bf16 %v547_v36, %v544_v34  ;;  %v1145_v38 = vpop.f32.mrb[7].mxu1 }
 0x336   : > { %1147 = vmatpush3.bf16.msra.mxu1 %v551_v37 }
 0x337   : > { %1152 = vmatprep.subr.bf16.mxu1 %v1481_v0 }
 0x339   : > { %1149 = vmatmul.mubr.msk.bf16.vlgmr.msra.gmra.mrb[8].mxu1 %vm397_vm1, %v1728_v15 }
 0x33a   : > { %1153 = vmatpush3.bf16.msra.mxu1 %v1284_v39  ;;  %1168 = vmatprep.mubr.msk.bf16.mxu1 %vm1482_vm0, %v1481_v0 }
 0x33b   : > { %1154 = vmatprep.subr.bf16.mxu1 %v1481_v0 }
 0x33e   : > { %1155 = vmatpush3.bf16.msra.mxu1 %v1285_v40 }
 0x33f   : > { %1156 = vmatprep.subr.bf16.mxu1 %v1481_v0 }
 0x342   : > { %1157 = vmatpush3.bf16.msra.mxu1 %v1286_v41 }
 0x343   : > { %1158 = vmatprep.subr.bf16.mxu1 %v1481_v0 }
 0x346   : > { %1159 = vmatpush3.bf16.msra.mxu1 %v1287_v42 }
 0x347   : > { %1160 = vmatprep.subr.bf16.mxu1 %v1481_v0 }
 0x34a   : > { %1161 = vmatpush3.bf16.msra.mxu1 %v1288_v43 }
 0x34b   : > { %1162 = vmatprep.subr.bf16.mxu1 %v1481_v0 }
 0x34e   : > { %1163 = vmatpush3.bf16.msra.mxu1 %v1289_v44 }
 0x34f   : > { %1164 = vmatprep.subr.bf16.mxu1 %v1481_v0 }
 0x352   : > { %1165 = vmatpush3.bf16.msra.mxu1 %v1290_v45 }
 0x353   : > { %1166 = vmatprep.subr.bf16.mxu1 %v1481_v0 }
 0x356   : > { %1167 = vmatpush3.bf16.msra.mxu1 %v1291_v46 }
 0x40c   : > { %v591_v48 = vpop.f32.mrb[8].mxu1 }
 0x40d   : > { %v592_v49 = vadd.f32 %v1027_v47, %v591_v48  ;;  %v1150_v50 = vpop.f32.mrb[9].mxu1 }
 0x40e   : > { %v594_v51 = vpop.f32.mrb[10].mxu1 }
 0x40f   : > { %v595_v52 = vadd.f32 %v1027_v47, %v594_v51  ;;  %v1151_v53 = vpop.f32.mrb[11].mxu1  ;;  %1304 = vtanh.f32 %v592_v49 }
 0x411   : > { %1306 = vtanh.f32 %v595_v52 }
 0x419   : > { %v1305_v54 = vpop.eup %1304 }
 0x41b   : > { %v1307_v55 = vpop.eup %1306 }
 0x41c   : > { %v600_v56 = vpack.c.bf16 %v1307_v55, %v1305_v54 }
 0x41e   : > { %1169 = vmatmul.mubr.bf16.vlgmr.msra.gmra.mrb[12].mxu1 %v600_v56 }
 0x4f1   : > { %v700_v57 = vpop.f32.mrb[12].mxu1 }
 0x4f2   : > { %v1170_v58 = vpop.f32.mrb[13].mxu1 }
 0x4f3   : > { %v703_v59 = vpop.f32.mrb[14].mxu1 }
 0x4f4   : > { %v707_v60 = vpack.c.bf16 %v703_v59, %v700_v57  ;;  %v1171_v61 = vpop.f32.mrb[15].mxu1 }
 0x4f6   : > { %1173 = vmatpush3.bf16.msra.mxu0 %v707_v60 }
 0x4f7   : > { %1178 = vmatprep.subr.bf16.mxu0 %v1481_v0 }
 0x4f9   : > { %1175 = vmatmul.mubr.msk.bf16.vlgmr.msra.gmra.mrb[4].mxu0 %vm397_vm1, %v1728_v15 }
 0x4fa   : > { %1179 = vmatpush3.bf16.msra.mxu0 %v1292_v62  ;;  %1194 = vmatprep.mubr.msk.bf16.mxu0 %vm1482_vm0, %v1481_v0 }
 0x4fb   : > { %1180 = vmatprep.subr.bf16.mxu0 %v1481_v0 }
 0x4fe   : > { %1181 = vmatpush3.bf16.msra.mxu0 %v1293_v63 }
 0x4ff   : > { %1182 = vmatprep.subr.bf16.mxu0 %v1481_v0 }
 0x502   : > { %1183 = vmatpush3.bf16.msra.mxu0 %v1294_v1 }
 0x503   : > { %1184 = vmatprep.subr.bf16.mxu0 %v1481_v0 }
 0x506   : > { %1185 = vmatpush3.bf16.msra.mxu0 %v1295_v2 }
 0x507   : > { %1186 = vmatprep.subr.bf16.mxu0 %v1481_v0 }
 0x50a   : > { %1187 = vmatpush3.bf16.msra.mxu0 %v1296_v3 }
 0x50b   : > { %1188 = vmatprep.subr.bf16.mxu0 %v1481_v0 }
 0x50e   : > { %1189 = vmatpush3.bf16.msra.mxu0 %v1297_v4 }
 0x50f   : > { %1190 = vmatprep.subr.bf16.mxu0 %v1481_v0 }
 0x512   : > { %1191 = vmatpush3.bf16.msra.mxu0 %v1298_v5 }
 0x513   : > { %1192 = vmatprep.subr.bf16.mxu0 %v1481_v0 }
 0x516   : > { %1193 = vmatpush3.bf16.msra.mxu0 %v1299_v6 }
 0x5cc   : > { %v747_v8 = vpop.f32.mrb[4].mxu0 }
 0x5cd   : > { %v748_v9 = vadd.f32 %v1037_v7, %v747_v8  ;;  %v1176_v10 = vpop.f32.mrb[5].mxu0 }
 0x5ce   : > { %v750_v11 = vpop.f32.mrb[6].mxu0 }
 0x5cf   : > { %1308 = vtanh.f32 %v748_v9  ;;  %v751_v12 = vadd.f32 %v1037_v7, %v750_v11  ;;  %v1177_v13 = vpop.f32.mrb[7].mxu0 }
 0x5d1   : > { %1310 = vtanh.f32 %v751_v12 }
 0x5d9   : > { %v1309_v14 = vpop.eup %1308 }
 0x5da   : > { %1048 = vst [vmem:[%s269_s10 + $0x10] sm:$0xff] %v1309_v14 }
 0x5db   : > { %v1311_v15 = vpop.eup %1310 }
 0x5dc   : > { %v756_v0 = vpack.c.bf16 %v1311_v15, %v1309_v14  ;;  %1049 = vst [vmem:[%s269_s10 + $0x18] sm:$0xff] %v1311_v15 }
 0x5de   : > { %1195 = vmatmul.mubr.bf16.vlgmr.msra.gmra.mrb[8].mxu0 %v756_v0 }
 0x6b1   : > { %v861_v17 = vpop.f32.mrb[8].mxu0 }
 0x6b2   : > { %v862_v18 = vadd.f32 %v1039_v16, %v861_v17  ;;  %v1196_v19 = vpop.f32.mrb[9].mxu0 }
 0x6b3   : > { %v864_v20 = vpop.f32.mrb[10].mxu0 }
 0x6b4   : > { %868 = vst [vmem:[%s269_s10] sm:$0xff] %v862_v18  ;;  %v865_v21 = vadd.f32 %v1039_v16, %v864_v20  ;;  %v1197_v22 = vpop.f32.mrb[11].mxu0 }
 0x6b6   : > { %869 = vst [vmem:[%s269_s10 + $0x8] sm:$0xff] %v865_v21 }
 0x6b7   : > { %1413 = shalt.err (!%p1410_p6)
}
 0x6b8   : > { %s1414_s21 = scalar_lea.hbm %s1788_s11, 512  ;;  %s1418_s7 = scalar_lea.hbm %s1835_s4, 4096 }
 0x6b9   : > { %p1415_p8 = scmp.ne.s32.totalorder %s1788_s11, %s1414_s21  ;;  %p1419_p4 = scmp.lt.u32.totalorder %s1788_s11, %s1835_s4 }
 0x6ba   : > { %p1420_p10 = scmp.lt.u32.totalorder %s1418_s7, %s1414_s21  ;;  %p1422_p3 = scmp.lt.u32.totalorder %s1414_s21, %s1788_s11 }
 0x6bb   : > { %p1416_p11 = pnand %p1415_p8, %p1597_p12 }
 0x6bc   : > { %p1421_p13 = por %p1420_p10, %p1419_p4 }
 0x6bd   : > { %p1417_p0 = pneg %p1416_p11 }
 0x6be   : > { %p1423_p7 = por %p1422_p3, %p1421_p13 }
 0x6c0   : > { %p1424_p9 = pnand %p1423_p7, %p1417_p0 }
 0x6c2   : > { %1427 = shalt.err (!%p1424_p9)
}
 0x6c3   : > { %s1484_s5 = smov 128   ;;  %s1485_s10 = smov 8  }
 0x6c4   : > { %1206 = dma.vmem_to_hbm [thread:$0]  (%p1597_p12), %s1783_s25, 512, %s1788_s11, %s874_s8, %s1484_s5, %s1484_s5, %s1485_s10  }
 0x6c5 PF: > { %p1226_p1 = scmp.ge.s32.totalorder %s1474_s18, 2  ;;  %s902_s2 = sand.u32 1, %s1462_s15  }
 0x6c6   : > { %p1861_p5 = scmp.ne.s32.totalorder %s1846_s22, 0  ;;  %s903_s6 = scalar_lea.sflag [#allocation4], %s902_s2 }
 0x6c8   : > { %p1220_p2 = pnand %p1226_p1, %p1861_p5 }
 0x6ca   : > { %1457 = dma.done.wait (!%p1220_p2), %s903_s6, 512  }
 0x6cb   : > { %1459 = vsyncadd (!%p1220_p2), %s903_s6, 4294966784  ;;  %s1862_s29 = sld [smem:[#allocation13_spill]]  ;;  %p20_p6 = scmp.ge.s32.totalorder %s1564_s27, 10  }
 0x6cc   : > { %s1863_s15 = smov %s1466_s16  ;;  %s1864_s16 = smov %s1470_s17 }
 0x6cd   : > { %s1866_s18 = smov %s1564_s27  ;;  %22 = sbr.rel (!%p20_p6) target bundleno = 10 (0xa), region = 102 }
 0x6d1   : > { %s1865_s17 = smov %s1862_s29 }
 0x6d4   :  { %908 = vsyncpa [#allocation3], 1 }
 0x6d5   :  { %910 = vsyncpa [#allocation3 + $0x1], 1 }
 0x6d6   :  { %911 = vsyncpa [#allocation6], 1 }
 0x6d7   :  { %913 = vsyncpa [#allocation6 + $0x1], 1 }
 0x6d8   :  { %914 = vsyncpa [#allocation4], 1 }
 0x6d9   :  { %916 = vsyncpa [#allocation4 + $0x1], 1 }

</bundles_post_ra>
